<compile_context>
chip_gen: v7x
topology: tpu7x:2x2x1
jax: 0.10.0
libtpu: 0.0.40
codegen_flags: <defaults>
</compile_context>

<pallas_src>
import functools

import jax
import jax.numpy as jnp
from jax.experimental import pallas as pl
from jax.experimental.pallas import tpu as pltpu


def _mha_kernel(x_ref, wqkv_ref, bqkv_ref, wo_ref, bo_ref, o_ref, *,
                num_heads, embed_dim, seq_len):
    """Multi-head self-attention for one lane-dense (Bt, E*L) block.

    x_ref    : (Bt, E*L)  input block = row-major view of (Bt, E, L), f32
    wqkv_ref : (E, 3E)    packed in_proj weight, pre-transposed, Q rows pre-scaled, bf16
    bqkv_ref : (1, 3E)    packed in_proj bias, Q slice pre-scaled, f32
    wo_ref   : (E, E)     out_proj weight, pre-transposed (E_in, E_out), bf16
    bo_ref   : (1, E)     out_proj bias, f32
    o_ref    : (Bt, E*L)  output block = row-major view of (Bt, E, L)
    """
    E, L, H = embed_dim, seq_len, num_heads
    Bt = x_ref.shape[0]
    Dh = E // H

    # Lane-dense load, then on-chip relayout to token-major rows (XLU work, not HBM).
    x = x_ref[...].reshape(Bt, E, L)
    x = jnp.transpose(x, (0, 2, 1)).reshape(Bt * L, E).astype(jnp.bfloat16)

    # Packed QKV projection: one MXU matmul with f32 accumulation; bias add in f32;
    # a single full-width bf16 cast (1/sqrt(Dh) already folded into the Q weights/bias).
    qkv = jnp.dot(x, wqkv_ref[...], preferred_element_type=jnp.float32)
    qkv = (qkv + bqkv_ref[...]).astype(jnp.bfloat16).reshape(Bt, L, 3 * E)

    # Per-head attention (H is tiny and static); each einsum is batched over Bt.
    head_outs = []
    for h in range(H):
        lo = h * Dh
        qh = qkv[:, :, lo:lo + Dh]                     # (Bt, L, Dh) bf16 (pre-scaled)
        kh = qkv[:, :, E + lo:E + lo + Dh]             # (Bt, L, Dh) bf16
        vh = qkv[:, :, 2 * E + lo:2 * E + lo + Dh]     # (Bt, L, Dh) bf16

        s = jnp.einsum("bqd,bkd->bqk", qh, kh,
                       preferred_element_type=jnp.float32)            # (Bt, L, L) f32
        s = s - jnp.max(s, axis=-1, keepdims=True)
        p = jnp.exp(s)
        p = p / jnp.sum(p, axis=-1, keepdims=True)                    # exact softmax

        head_outs.append(
            jnp.einsum("bqk,bkd->bqd", p.astype(jnp.bfloat16), vh,
                       preferred_element_type=jnp.float32))           # (Bt, L, Dh) f32

    # Heads are adjacent along E: one lane-concat, then a single out_proj matmul (K=E).
    merged = jnp.concatenate(head_outs, axis=-1).reshape(Bt * L, E)
    out = jnp.dot(merged.astype(jnp.bfloat16), wo_ref[...],
                  preferred_element_type=jnp.float32) + bo_ref[...]   # (Bt*L, E) f32

    # Back to the module's channels-first layout, flattened lane-dense for the store.
    out = jnp.transpose(out.reshape(Bt, L, E), (0, 2, 1)).reshape(Bt, E * L)
    o_ref[...] = out.astype(o_ref.dtype)


def prepare_params(params, *, num_heads):
    """One-time weight prep (hoist out of the per-call path / cache the result):
    transpose to contraction-major, cast to bf16, fold 1/sqrt(head_dim) into Q."""
    w_in = jnp.asarray(params["in_proj_weight"], jnp.float32)     # (3E, E)
    b_in = jnp.asarray(params["in_proj_bias"], jnp.float32)       # (3E,)
    w_out = jnp.asarray(params["out_proj_weight"], jnp.float32)   # (E, E)
    b_out = jnp.asarray(params["out_proj_bias"], jnp.float32)     # (E,)

    E = w_out.shape[0]
    scale = 1.0 / float(E // num_heads) ** 0.5
    row_scale = jnp.concatenate(
        [jnp.full((E,), scale, jnp.float32), jnp.ones((2 * E,), jnp.float32)])

    wqkv_t = (w_in * row_scale[:, None]).T.astype(jnp.bfloat16)   # (E, 3E)
    bqkv = (b_in * row_scale).reshape(1, 3 * E).astype(jnp.float32)
    wo_t = w_out.T.astype(jnp.bfloat16)                           # (E_in, E_out)
    bo = b_out.reshape(1, E).astype(jnp.float32)
    return wqkv_t, bqkv, wo_t, bo


def _num_tensorcores_per_chip():
    """Best-effort TensorCore count (v7x has 2); default to 1 (v5e/v6e)."""
    try:
        info = pltpu.get_tpu_info()
        for name in ("num_cores", "num_tensorcores", "tensorcores_per_chip",
                     "cores_per_chip", "num_cores_per_chip", "core_count"):
            v = getattr(info, name, None)
            if isinstance(v, int) and v > 0:
                return v
    except Exception:
        pass
    return 1


def _pick_block_batch(B, C, L, num_cores):
    """Pick the per-grid-step batch tile Bt for the 2D (B, C*L) view.

    * (8,128) rule on the block's sublane dim: Bt % 8 == 0 or Bt == B.
    * Fill the 256-wide MXU M dim (Bt*L rows) on v6e/v7x when possible.
    * Keep activations well inside every chip's default scoped VMEM (incl. v5e 16 MiB,
      v7x 64 MiB physical).
    * Only force multiple grid steps when the chip actually has >1 TensorCore.
    """
    cands = [d for d in range(1, B + 1) if B % d == 0 and (d == B or d % 8 == 0)]

    def vmem_bytes(bt):
        io = 4 * bt * C * L * 4                              # double-buffered in+out f32
        acts = bt * L * (3 * C) * 6                          # qkv f32 + bf16 copies
        acts += 2 * bt * L * L * 4 + 2 * bt * L * C * 4      # scores + merged heads
        return io + acts

    budget = 12 * 1024 * 1024
    target = max(1, pl.cdiv(256, max(L, 1)))                 # ~256 MXU rows per step
    ok = [d for d in cands if d <= target and vmem_bytes(d) <= budget]
    bt = max(ok) if ok else min(cands)

    if num_cores > 1 and B // bt < num_cores:                # keep all v7x TCs busy
        shard = [d for d in cands if B // d >= num_cores and vmem_bytes(d) <= budget]
        if shard:
            bt = max(shard)
    return bt


def global_context_block(x_bcl, prepared, *, num_heads=2, block_batch=None):
    """x_bcl: (B, C, L) float32; `prepared` = prepare_params(...) (computed once).
    Returns (B, C, L), matching the PyTorch module's forward."""
    wqkv_t, bqkv, wo_t, bo = prepared
    B, C, L = x_bcl.shape
    E = C
    assert E % num_heads == 0

    num_cores = _num_tensorcores_per_chip()
    Bt = _pick_block_batch(B, C, L, num_cores) if block_batch is None else block_batch
    assert B % Bt == 0 and (Bt == B or Bt % 8 == 0)

    # Lane-dense I/O: (B, C, L) -> (B, C*L) is a free row-major view; every DMA row
    # and vector store becomes a contiguous, unmasked multiple-of-128-lane slab.
    x_flat = x_bcl.reshape(B, C * L)

    kernel = functools.partial(_mha_kernel, num_heads=num_heads,
                               embed_dim=E, seq_len=L)

    out_flat = pl.pallas_call(
        kernel,
        out_shape=jax.ShapeDtypeStruct((B, C * L), x_bcl.dtype),
        grid_spec=pltpu.PrefetchScalarGridSpec(
            num_scalar_prefetch=0,
            grid=(B // Bt,),
            in_specs=[
                pl.BlockSpec((Bt, C * L), lambda b: (b, 0)),
                pl.BlockSpec((E, 3 * E), lambda b: (0, 0)),
                pl.BlockSpec((1, 3 * E), lambda b: (0, 0)),
                pl.BlockSpec((E, E), lambda b: (0, 0)),
                pl.BlockSpec((1, E), lambda b: (0, 0)),
            ],
            out_specs=pl.BlockSpec((Bt, C * L), lambda b: (b, 0)),
        ),
        compiler_params=pltpu.CompilerParams(
            dimension_semantics=("parallel",)),
    )(x_flat, wqkv_t, bqkv, wo_t, bo)

    return out_flat.reshape(B, C, L)


def _reference(x_bcl, params, *, num_heads=2):
    """Pure-JAX f32 reference mirroring torch.nn.MultiheadAttention forward."""
    B, C, L = x_bcl.shape
    E = C
    head_dim = E // num_heads
    scale = 1.0 / float(head_dim) ** 0.5

    x = jnp.transpose(x_bcl, (0, 2, 1))             # (B, L, E)
    qkv = x @ params["in_proj_weight"].T + params["in_proj_bias"]
    q, k, v = qkv[..., :E], qkv[..., E:2 * E], qkv[..., 2 * E:]

    def split_heads(t):  # (B, L, E) -> (B, H, L, Dh)
        return jnp.transpose(t.reshape(B, L, num_heads, head_dim), (0, 2, 1, 3))

    qh, kh, vh = split_heads(q) * scale, split_heads(k), split_heads(v)
    s = jnp.einsum("bhqd,bhkd->bhqk", qh, kh)
    p = jax.nn.softmax(s, axis=-1)
    o = jnp.einsum("bhqk,bhkd->bhqd", p, vh)        # (B, H, L, Dh)
    o = jnp.transpose(o, (0, 2, 1, 3)).reshape(B, L, E)
    o = o @ params["out_proj_weight"].T + params["out_proj_bias"]
    return jnp.transpose(o, (0, 2, 1))              # (B, C, L)


if __name__ == "__main__":
    B, C, L = 2, 32, 16   # batch=2, in_channels=32 (embed_dim, 2 heads), seq=16
    num_heads = 2

    key = jax.random.PRNGKey(0)
    k_x, k_w, k_b, k_wo, k_bo = jax.random.split(key, 5)

    x = jax.random.normal(k_x, (B, C, L), dtype=jnp.float32)

    params = {
        "in_proj_weight": 0.1 * jax.random.normal(k_w, (3 * C, C), dtype=jnp.float32),
        "in_proj_bias": 0.1 * jax.random.normal(k_b, (3 * C,), dtype=jnp.float32),
        "out_proj_weight": 0.1 * jax.random.normal(k_wo, (C, C), dtype=jnp.float32),
        "out_proj_bias": 0.1 * jax.random.normal(k_bo, (C,), dtype=jnp.float32),
    }

    # One-time weight prep (hoisted out of the call path).
    prepared = jax.block_until_ready(prepare_params(params, num_heads=num_heads))

    out = global_context_block(x, prepared, num_heads=num_heads)
    out = jax.block_until_ready(out)

    ref = jax.block_until_ready(_reference(x, params, num_heads=num_heads))
    assert out.shape == (B, C, L)
    # bf16 MXU operands with f32 accumulation; softmax is exact (no approx reciprocal).
    assert jnp.allclose(out, ref, atol=2e-2, rtol=2e-2), "mismatch vs reference"

    print("KERNEL_OK")
</pallas_src>

<mosaic_0001>
module attributes {stable_mosaic.version = 11 : i64} {
  func.func @_mha_kernel(%arg0: i32, %arg1: memref<2x512xf32, #tpu.memory_space<vmem>>, %arg2: memref<32x96xbf16, #tpu.memory_space<vmem>>, %arg3: memref<1x96xf32, #tpu.memory_space<vmem>>, %arg4: memref<32x32xbf16, #tpu.memory_space<vmem>>, %arg5: memref<1x32xf32, #tpu.memory_space<vmem>>, %arg6: memref<2x512xf32, #tpu.memory_space<vmem>>) attributes {dimension_semantics = [#tpu.dimension_semantics<parallel>], iteration_bounds = array<i64: 1>, scalar_prefetch = 0 : i64, scratch_operands = 0 : i64, tpu.core_type = #tpu.core_type<tc>, window_params = [{transform_indices = @transform_0, window_bounds = array<i64: 2, 512>}, {pipeline_mode = #tpu.pipeline_mode<synchronous>, transform_indices = @transform_1, window_bounds = array<i64: 32, 96>}, {pipeline_mode = #tpu.pipeline_mode<synchronous>, transform_indices = @transform_2, window_bounds = array<i64: 1, 96>}, {pipeline_mode = #tpu.pipeline_mode<synchronous>, transform_indices = @transform_3, window_bounds = array<i64: 32, 32>}, {pipeline_mode = #tpu.pipeline_mode<synchronous>, transform_indices = @transform_4, window_bounds = array<i64: 1, 32>}, {transform_indices = @transform_5, window_bounds = array<i64: 2, 512>}]} {
    %c0 = arith.constant 0 : index
    %c0_0 = arith.constant 0 : index
    %0 = vector.load %arg1[%c0, %c0_0] : memref<2x512xf32, #tpu.memory_space<vmem>>, vector<2x512xf32>
    %1 = vector.shape_cast %0 : vector<2x512xf32> to vector<2x32x16xf32>
    %2 = tpu.transpose %1, [0, 2, 1] : vector<2x32x16xf32> -> vector<2x16x32xf32>
    %3 = vector.shape_cast %2 : vector<2x16x32xf32> to vector<32x32xf32>
    %4 = arith.truncf %3 : vector<32x32xf32> to vector<32x32xbf16>
    %c0_1 = arith.constant 0 : index
    %c0_2 = arith.constant 0 : index
    %5 = vector.load %arg2[%c0_1, %c0_2] : memref<32x96xbf16, #tpu.memory_space<vmem>>, vector<32x96xbf16>
    %cst = arith.constant dense<0.000000e+00> : vector<32x96xf32>
    %6 = tpu.matmul %4, %5, %cst {dimension_numbers = #tpu.dot_dimension_numbers<[1], [0], [0], [1], [0, 0, 1, 1], [], []>} : vector<32x32xbf16>, vector<32x96xbf16>, vector<32x96xf32> -> vector<32x96xf32>
    %c0_3 = arith.constant 0 : index
    %c0_4 = arith.constant 0 : index
    %7 = vector.load %arg3[%c0_3, %c0_4] : memref<1x96xf32, #tpu.memory_space<vmem>>, vector<1x96xf32>
    %8 = vector.broadcast %7 : vector<1x96xf32> to vector<32x96xf32>
    %9 = arith.addf %6, %8 : vector<32x96xf32>
    %10 = arith.truncf %9 : vector<32x96xf32> to vector<32x96xbf16>
    %11 = vector.shape_cast %10 : vector<32x96xbf16> to vector<2x16x96xbf16>
    %12 = vector.extract_strided_slice %11 {offsets = [0, 0, 0], sizes = [2, 16, 16], strides = [1, 1, 1]} : vector<2x16x96xbf16> to vector<2x16x16xbf16>
    %13 = vector.extract_strided_slice %11 {offsets = [0, 0, 32], sizes = [2, 16, 16], strides = [1, 1, 1]} : vector<2x16x96xbf16> to vector<2x16x16xbf16>
    %14 = vector.extract_strided_slice %11 {offsets = [0, 0, 64], sizes = [2, 16, 16], strides = [1, 1, 1]} : vector<2x16x96xbf16> to vector<2x16x16xbf16>
    "tpu.trace_start"() <{level = 10 : i32, message = "bqd,bkd->bqk"}> : () -> ()
    %cst_5 = arith.constant dense<0.000000e+00> : vector<2x16x16xf32>
    %15 = tpu.matmul %12, %13, %cst_5 {dimension_numbers = #tpu.dot_dimension_numbers<[2], [2], [1], [1], [0, 0, 0, 1, 1, 1], [0], [0]>} : vector<2x16x16xbf16>, vector<2x16x16xbf16>, vector<2x16x16xf32> -> vector<2x16x16xf32>
    "tpu.trace_stop"() : () -> ()
    %cst_6 = arith.constant dense<0xFF800000> : vector<2x16xf32>
    %16 = vector.multi_reduction <maximumf>, %15, %cst_6 [2] : vector<2x16x16xf32> to vector<2x16xf32>
    %17 = vector.shape_cast %16 : vector<2x16xf32> to vector<2x16x1xf32>
    %18 = vector.broadcast %17 : vector<2x16x1xf32> to vector<2x16x16xf32>
    %19 = arith.subf %15, %18 : vector<2x16x16xf32>
    %20 = math.exp %19 : vector<2x16x16xf32>
    %cst_7 = arith.constant dense<0.000000e+00> : vector<2x16xf32>
    %21 = vector.multi_reduction <add>, %20, %cst_7 [2] : vector<2x16x16xf32> to vector<2x16xf32>
    %22 = vector.shape_cast %21 : vector<2x16xf32> to vector<2x16x1xf32>
    %23 = vector.broadcast %22 : vector<2x16x1xf32> to vector<2x16x16xf32>
    %24 = arith.divf %20, %23 : vector<2x16x16xf32>
    %25 = arith.truncf %24 : vector<2x16x16xf32> to vector<2x16x16xbf16>
    "tpu.trace_start"() <{level = 10 : i32, message = "bqk,bkd->bqd"}> : () -> ()
    %cst_8 = arith.constant dense<0.000000e+00> : vector<2x16x16xf32>
    %26 = tpu.matmul %25, %14, %cst_8 {dimension_numbers = #tpu.dot_dimension_numbers<[2], [1], [1], [2], [0, 0, 0, 1, 1, 2], [0], [0]>} : vector<2x16x16xbf16>, vector<2x16x16xbf16>, vector<2x16x16xf32> -> vector<2x16x16xf32>
    "tpu.trace_stop"() : () -> ()
    %27 = vector.extract_strided_slice %11 {offsets = [0, 0, 16], sizes = [2, 16, 16], strides = [1, 1, 1]} : vector<2x16x96xbf16> to vector<2x16x16xbf16>
    %28 = vector.extract_strided_slice %11 {offsets = [0, 0, 48], sizes = [2, 16, 16], strides = [1, 1, 1]} : vector<2x16x96xbf16> to vector<2x16x16xbf16>
    %29 = vector.extract_strided_slice %11 {offsets = [0, 0, 80], sizes = [2, 16, 16], strides = [1, 1, 1]} : vector<2x16x96xbf16> to vector<2x16x16xbf16>
    "tpu.trace_start"() <{level = 10 : i32, message = "bqd,bkd->bqk"}> : () -> ()
    %cst_9 = arith.constant dense<0.000000e+00> : vector<2x16x16xf32>
    %30 = tpu.matmul %27, %28, %cst_9 {dimension_numbers = #tpu.dot_dimension_numbers<[2], [2], [1], [1], [0, 0, 0, 1, 1, 1], [0], [0]>} : vector<2x16x16xbf16>, vector<2x16x16xbf16>, vector<2x16x16xf32> -> vector<2x16x16xf32>
    "tpu.trace_stop"() : () -> ()
    %cst_10 = arith.constant dense<0xFF800000> : vector<2x16xf32>
    %31 = vector.multi_reduction <maximumf>, %30, %cst_10 [2] : vector<2x16x16xf32> to vector<2x16xf32>
    %32 = vector.shape_cast %31 : vector<2x16xf32> to vector<2x16x1xf32>
    %33 = vector.broadcast %32 : vector<2x16x1xf32> to vector<2x16x16xf32>
    %34 = arith.subf %30, %33 : vector<2x16x16xf32>
    %35 = math.exp %34 : vector<2x16x16xf32>
    %cst_11 = arith.constant dense<0.000000e+00> : vector<2x16xf32>
    %36 = vector.multi_reduction <add>, %35, %cst_11 [2] : vector<2x16x16xf32> to vector<2x16xf32>
    %37 = vector.shape_cast %36 : vector<2x16xf32> to vector<2x16x1xf32>
    %38 = vector.broadcast %37 : vector<2x16x1xf32> to vector<2x16x16xf32>
    %39 = arith.divf %35, %38 : vector<2x16x16xf32>
    %40 = arith.truncf %39 : vector<2x16x16xf32> to vector<2x16x16xbf16>
    "tpu.trace_start"() <{level = 10 : i32, message = "bqk,bkd->bqd"}> : () -> ()
    %cst_12 = arith.constant dense<0.000000e+00> : vector<2x16x16xf32>
    %41 = tpu.matmul %40, %29, %cst_12 {dimension_numbers = #tpu.dot_dimension_numbers<[2], [1], [1], [2], [0, 0, 0, 1, 1, 2], [0], [0]>} : vector<2x16x16xbf16>, vector<2x16x16xbf16>, vector<2x16x16xf32> -> vector<2x16x16xf32>
    "tpu.trace_stop"() : () -> ()
    %42 = tpu.concatenate %26, %41 in 2 : vector<2x16x16xf32>, vector<2x16x16xf32> -> vector<2x16x32xf32>
    %43 = vector.shape_cast %42 : vector<2x16x32xf32> to vector<32x32xf32>
    %44 = arith.truncf %43 : vector<32x32xf32> to vector<32x32xbf16>
    %c0_13 = arith.constant 0 : index
    %c0_14 = arith.constant 0 : index
    %45 = vector.load %arg4[%c0_13, %c0_14] : memref<32x32xbf16, #tpu.memory_space<vmem>>, vector<32x32xbf16>
    %cst_15 = arith.constant dense<0.000000e+00> : vector<32x32xf32>
    %46 = tpu.matmul %44, %45, %cst_15 {dimension_numbers = #tpu.dot_dimension_numbers<[1], [0], [0], [1], [0, 0, 1, 1], [], []>} : vector<32x32xbf16>, vector<32x32xbf16>, vector<32x32xf32> -> vector<32x32xf32>
    %c0_16 = arith.constant 0 : index
    %c0_17 = arith.constant 0 : index
    %47 = vector.load %arg5[%c0_16, %c0_17] : memref<1x32xf32, #tpu.memory_space<vmem>>, vector<1x32xf32>
    %48 = vector.broadcast %47 : vector<1x32xf32> to vector<32x32xf32>
    %49 = arith.addf %46, %48 : vector<32x32xf32>
    %50 = vector.shape_cast %49 : vector<32x32xf32> to vector<2x16x32xf32>
    %51 = tpu.transpose %50, [0, 2, 1] : vector<2x16x32xf32> -> vector<2x32x16xf32>
    %52 = vector.shape_cast %51 : vector<2x32x16xf32> to vector<2x512xf32>
    %c0_18 = arith.constant 0 : index
    %c0_19 = arith.constant 0 : index
    %53 = vector.load %arg6[%c0_18, %c0_19] : memref<2x512xf32, #tpu.memory_space<vmem>>, vector<2x512xf32>
    tpu.vector_store %arg6[%c0_18, %c0_19], %52 {strides = array<i32>} : memref<2x512xf32, #tpu.memory_space<vmem>>, vector<2x512xf32>,
    return
  }
  func.func @transform_0(%arg0: i32) -> (i32, i32) {
    %c0_i32 = arith.constant 0 : i32
    %c0_i32_0 = arith.constant 0 : i32
    return %arg0, %c0_i32 : i32, i32
  }
  func.func @transform_1(%arg0: i32) -> (i32, i32) {
    %c0_i32 = arith.constant 0 : i32
    %c0_i32_0 = arith.constant 0 : i32
    %c0_i32_1 = arith.constant 0 : i32
    return %c0_i32, %c0_i32_0 : i32, i32
  }
  func.func @transform_2(%arg0: i32) -> (i32, i32) {
    %c0_i32 = arith.constant 0 : i32
    %c0_i32_0 = arith.constant 0 : i32
    %c0_i32_1 = arith.constant 0 : i32
    return %c0_i32, %c0_i32_0 : i32, i32
  }
  func.func @transform_3(%arg0: i32) -> (i32, i32) {
    %c0_i32 = arith.constant 0 : i32
    %c0_i32_0 = arith.constant 0 : i32
    %c0_i32_1 = arith.constant 0 : i32
    return %c0_i32, %c0_i32_0 : i32, i32
  }
  func.func @transform_4(%arg0: i32) -> (i32, i32) {
    %c0_i32 = arith.constant 0 : i32
    %c0_i32_0 = arith.constant 0 : i32
    %c0_i32_1 = arith.constant 0 : i32
    return %c0_i32, %c0_i32_0 : i32, i32
  }
  func.func @transform_5(%arg0: i32) -> (i32, i32) {
    %c0_i32 = arith.constant 0 : i32
    %c0_i32_0 = arith.constant 0 : i32
    return %arg0, %c0_i32 : i32, i32
  }
}

</mosaic_0001>

<bundles_post_ra>
// kernel: tpu_custom_call.1
= control target key start
LH: loop header
LB: loop body
LE: loop exit
PB: predicated region body
PF: predicated region fallthrough
CT: control target
= control target key end

     0   :  { %10 = vsyncpa [#allocation3], 0  ;;  %s2357_s0 = inlined_call_operand.hbm [shape: f32[2,512], index: 0, kind: input, shape index: {}]   ;;  %s2358_s1 = inlined_call_operand.hbm [shape: bf16[32,96], index: 1, kind: input, shape index: {}]   ;;  %s2359_s2 = inlined_call_operand.vmem [shape: f32[1,96], index: 2, kind: input, shape index: {}]   ;;  %s2360_s3 = inlined_call_operand.hbm [shape: bf16[32,32], index: 3, kind: input, shape index: {}]   ;;  %s2361_s4 = inlined_call_operand.vmem [shape: f32[1,32], index: 4, kind: input, shape index: {}]   ;;  %s2362_s5 = inlined_call_operand.hbm [shape: f32[2,512], index: 5, kind: output, shape index: {}]  }
   0x1   :  { %11 = vsyncpa [#allocation6], 0 }
   0x2   :  { %12 = vsyncpa [#allocation4], 0  ;;  %s1982_s18 = smov [#allocation5]   ;;  %s1888_s22 = scalar_lea.hbm %s2358_s1, 256 }
   0x3   :  { %s28_s19 = sshll.u32 %s1982_s18, 4  ;;  %p1889_p0 = scmp.ne.s32.totalorder %s2358_s1, %s1888_s22  ;;  %s29_s19 = int_to_ptr.vmem [resolvable:$true] %s28_s19 }
   0x4   :  { %p1892_p1 = scmp.lt.u32.totalorder %s1888_s22, %s2358_s1 }
   0x6   :  { %p1894_p2 = pnand %p1892_p1, %p1889_p0 }
   0x8   :  { %1897 = shalt.err (!%p1894_p2)
}
   0x9   :  { %s1898_s27 = scalar_lea.vmem %s29_s19, 256  ;;  %p1903_p4 = scmp.lt.s32.totalorder %s29_s19, %s29_s19 }
   0xa   :  { %p1899_p3 = scmp.ne.s32.totalorder %s29_s19, %s1898_s27  ;;  %p1904_p5 = scmp.lt.s32.totalorder %s1898_s27, %s1898_s27 }
   0xc   :  { %p1905_p6 = por %p1904_p5, %p1903_p4 }
   0xe   :  { %p1906_p7 = pnand %p1905_p6, %p1899_p3 }
  0x10   :  { %1909 = shalt.err (!%p1906_p7)
}
  0x11   :  { %s1983_s28 = smov 64   ;;  %s1984_s29 = smov 4  }
  0x12   :  { %34 = dma.hbm_to_vmem [thread:$0]  %s2358_s1, 256, %s29_s19, [#allocation6], %s1983_s28, %s1983_s28, %s1984_s29  }
  0x13   :  { %s1985_s7 = smov [#allocation2]   ;;  %s1986_s9 = smov [#allocation7]  }
  0x14   :  { %s19_s8 = sshll.u32 %s1985_s7, 4  ;;  %s42_s10 = sshll.u32 %s1986_s9, 4  ;;  %s20_s8 = int_to_ptr.vmem [resolvable:$true] %s19_s8  ;;  %s43_s10 = int_to_ptr.vmem [resolvable:$true] %s42_s10 }
  0x15   :  { %s1910_s13 = scalar_lea.hbm %s2357_s0, 128 }
  0x16   :  { %p1911_p8 = scmp.ne.s32.totalorder %s2357_s0, %s1910_s13  ;;  %p1914_p9 = scmp.lt.u32.totalorder %s1910_s13, %s2357_s0 }
  0x18   :  { %p1916_p10 = pnand %p1914_p9, %p1911_p8 }
  0x1a   :  { %1919 = shalt.err (!%p1916_p10)
}
  0x1b   :  { %s1920_s1 = scalar_lea.vmem %s20_s8, 128  ;;  %p1925_p12 = scmp.lt.s32.totalorder %s20_s8, %s20_s8 }
  0x1c   :  { %p1921_p11 = scmp.ne.s32.totalorder %s20_s8, %s1920_s1  ;;  %p1926_p13 = scmp.lt.s32.totalorder %s1920_s1, %s1920_s1 }
  0x1e   :  { %p1927_p0 = por %p1926_p13, %p1925_p12 }
  0x20   :  { %p1928_p1 = pnand %p1927_p0, %p1921_p11 }
  0x22   :  { %1931 = shalt.err (!%p1928_p1)
}
  0x23   :  { %22 = dma.hbm_to_vmem [thread:$0]  %s2357_s0, 128, %s20_s8, [#allocation3]  }
  0x24   :  { %s1932_s22 = scalar_lea.hbm %s2360_s3, 256 }
  0x25   :  { %p1933_p2 = scmp.ne.s32.totalorder %s2360_s3, %s1932_s22  ;;  %p1936_p3 = scmp.lt.u32.totalorder %s1932_s22, %s2360_s3 }
  0x27   :  { %p1938_p4 = pnand %p1936_p3, %p1933_p2 }
  0x29   :  { %1941 = shalt.err (!%p1938_p4)
}
  0x2a   :  { %s1942_s27 = scalar_lea.vmem %s43_s10, 256  ;;  %p1947_p6 = scmp.lt.s32.totalorder %s43_s10, %s43_s10 }
  0x2b   :  { %p1943_p5 = scmp.ne.s32.totalorder %s43_s10, %s1942_s27  ;;  %p1948_p7 = scmp.lt.s32.totalorder %s1942_s27, %s1942_s27 }
  0x2d   :  { %p1949_p8 = por %p1948_p7, %p1947_p6 }
  0x2f   :  { %p1950_p9 = pnand %p1949_p8, %p1943_p5 }
  0x31   :  { %1953 = shalt.err (!%p1950_p9)
}
  0x32   :  { %48 = dma.hbm_to_vmem [thread:$0]  %s2360_s3, 256, %s43_s10, [#allocation6], %s1983_s28, %s1983_s28, %s1984_s29  }
  0x33   :  { %1976 = dma.done.wait [#allocation3], 128  }
  0x34   :  { %1977 = vsyncadd [#allocation3], 4294967168 }
  0x35   :  { %1978 = dma.done.wait [#allocation6], 512  }
  0x36   :  { %1979 = vsyncadd [#allocation6], 4294966784  ;;  %v61_v0 = vld [vmem:[#allocation2] sm:$0xff]  ;;  %s1987_s6 = smov 112   ;;  %s1988_s7 = smov 80   ;;  %v136_v3 = vlaneseq  ;;  %vm541_vm0 = vcmask 261120  }
  0x37   :  { %65 = vrot.lane.b32.xlu0 %v61_v0, %s1987_s6  ;;  %73 = vrot.lane.b32.xlu1 %v61_v0, %s1988_s7  ;;  %s1989_s8 = smov 96   ;;  %s1990_s9 = smov 48   ;;  %v1993_v1 = vmov 1934713408   ;;  %v1994_v4 = vmov 1983009808  }
  0x38   :  { %s1991_s3 = smov 32   ;;  %s1992_s29 = smov 16   ;;  %v134_v2 = vunpack.c.l.s4 %v1993_v1  ;;  %v311_v5 = vunpack.c.l.s4 %v1994_v4  ;;  %v137_v7 = vshrl.u32 %v136_v3, 7  ;;  %v63_v10 = vrot.slane %v61_v0, 2 }
  0x39   :  { %v93_v12 = vrot.slane %v61_v0, 4  ;;  %v109_v16 = vrot.slane %v61_v0, 6  ;;  %vm1996_vm1 = vmmov 0   ;;  %vm602_vm2 = vcmask 130048  }
  0x3a   :  { %v135_v6 = vunpack.c.0.s8 %v134_v2  ;;  %v312_v14 = vunpack.c.0.s8 %v311_v5  ;;  %vm1624_vm3 = vcmask 392192   ;;  %vm1626_vm4 = vcmask 523264  }
  0x3b   :  { %69 = vrot.lane.b32.xlu0 %v61_v0, %s1989_s8  ;;  %77 = vrot.lane.b32.xlu1 %v61_v0, %s1983_s28  ;;  %vm1628_vm5 = vcmask 654336   ;;  %vm1630_vm6 = vcmask 785408   ;;  %vm1632_vm7 = vcmask 916480  }
  0x3c   :  { %v2077_v15 = vsub.s32 %v135_v6, %v137_v7  ;;  %v2079_v31 = vsub.s32 %v312_v14, %v137_v7 }
  0x3f   :  { %81 = vrot.lane.b32.xlu0 %v61_v0, %s1990_s9  ;;  %85 = vrot.lane.b32.xlu1 %v61_v0, %s1991_s3 }
  0x43   :  { %89 = vrot.lane.b32.xlu0 %v61_v0, %s1992_s29 }
  0xa9   :  { %v66_v8 = vpop.permute.xlu0 %65  ;;  %v74_v9 = vpop.permute.xlu1 %73 }
  0xaa   :  { %v67_v11 = vrot.slane %v66_v8, 2  ;;  %v95_v13 = vrot.slane %v66_v8, 4  ;;  %v111_v17 = vrot.slane %v66_v8, 6  ;;  %v75_v18 = vrot.slane %v74_v9, 2 }
  0xab   :  { %v132_v21 = vcombine.low %v61_v0, %v66_v8  ;;  %v99_v22 = vrot.slane %v74_v9, 4  ;;  %v115_v23 = vrot.slane %v74_v9, 6 }
  0xac   :  { %v168_v25 = vcombine.low %v63_v10, %v67_v11  ;;  %v204_v29 = vcombine.low %v93_v12, %v95_v13  ;;  %v240_v44 = vcombine.low %v109_v16, %v111_v17 }
  0xad   :  { %v70_v19 = vpop.permute.xlu0 %69  ;;  %v78_v20 = vpop.permute.xlu1 %77  ;;  %v139_v42 = vrot.slane %v132_v21, %v2077_v15 }
  0xae   :  { %v71_v24 = vrot.slane %v70_v19, 2  ;;  %v97_v26 = vrot.slane %v70_v19, 4  ;;  %v113_v27 = vrot.slane %v70_v19, 6  ;;  %v141_v28 = vcombine.low %v70_v19, %v74_v9 }
  0xaf   :  { %v79_v30 = vrot.slane %v78_v20, 2  ;;  %v101_v34 = vrot.slane %v78_v20, 4  ;;  %v117_v35 = vrot.slane %v78_v20, 6  ;;  %v175_v43 = vrot.slane %v168_v25, %v2077_v15 }
  0xb0   :  { %v148_v32 = vrot.slane %v141_v28, %v2077_v15  ;;  %v177_v33 = vcombine.low %v71_v24, %v75_v18  ;;  %v213_v38 = vcombine.low %v97_v26, %v99_v22  ;;  %v249_v45 = vcombine.low %v113_v27, %v115_v23 }
  0xb1   :  { %v82_v36 = vpop.permute.xlu0 %81  ;;  %v86_v37 = vpop.permute.xlu1 %85  ;;  %v211_v46 = vrot.slane %v204_v29, %v2077_v15 }
  0xb2   :  { %v83_v39 = vrot.slane %v82_v36, 2  ;;  %v103_v40 = vrot.slane %v82_v36, 4  ;;  %v119_v41 = vrot.slane %v82_v36, 6  ;;  %v150_v47 = vcombine.low %v78_v20, %v82_v36 }
  0xb3   :  { %v87_v49 = vrot.slane %v86_v37, 2  ;;  %v184_v50 = vrot.slane %v177_v33, %v2077_v15  ;;  %v105_v52 = vrot.slane %v86_v37, 4  ;;  %v121_v53 = vrot.slane %v86_v37, 6 }
  0xb4   :  { %v186_v48 = vcombine.low %v79_v30, %v83_v39  ;;  %v222_v51 = vcombine.low %v101_v34, %v103_v40  ;;  %v220_v55 = vrot.slane %v213_v38, %v2077_v15  ;;  %v258_v56 = vcombine.low %v117_v35, %v119_v41 }
  0xb5   :  { %v90_v54 = vpop.permute.xlu0 %89  ;;  %v308_v58 = vcombine.low %v139_v42, %v148_v32  ;;  %v256_v59 = vrot.slane %v249_v45, %v2077_v15  ;;  %v157_v63 = vrot.slane %v150_v47, %v2077_v15  ;;  %v1694_v2 = vcombine.high %v139_v42, %v148_v32  ;;  %v1852_v47 = vld [vmem:[#allocation5] sm:$0xff]  }
  0xb6   :  { %v91_v57 = vrot.slane %v90_v54, 2  ;;  %v107_v60 = vrot.slane %v90_v54, 4  ;;  %v123_v61 = vrot.slane %v90_v54, 6  ;;  %v159_v62 = vcombine.low %v86_v37, %v90_v54  ;;  %1744 = vmatprep.subr.bf16.mxu0 %v1852_v47 }
  0xb7   :  { %v193_v0 = vrot.slane %v186_v48, %v2077_v15  ;;  %v229_v3 = vrot.slane %v222_v51, %v2077_v15  ;;  %v265_v7 = vrot.slane %v258_v56, %v2077_v15  ;;  %v316_v9 = vrot.slane %v308_v58, %v2079_v31  ;;  %1745 = vmatpush3.bf16.msra.mxu0 %v1852_v47 }
  0xb8   :  { %v195_v1 = vcombine.low %v87_v49, %v91_v57  ;;  %v166_v4 = vrot.slane %v159_v62, %v2077_v15  ;;  %v231_v5 = vcombine.low %v105_v52, %v107_v60  ;;  %v267_v6 = vcombine.low %v121_v53, %v123_v61  ;;  %v1853_v53 = vld [vmem:[#allocation5 + $0x8] sm:$0xff]  }
  0xb9   :  { %v325_v10 = vcombine.low %v175_v43, %v184_v50  ;;  %v1696_v14 = vcombine.high %v175_v43, %v184_v50  ;;  %v384_v17 = vrot.slane %v1694_v2, %v2079_v31  ;;  %v342_v27 = vcombine.low %v211_v46, %v220_v55  ;;  %1746 = vmatprep.subr.bf16.mxu0 %v1853_v53 }
  0xba   :  { %v202_v8 = vrot.slane %v195_v1, %v2077_v15  ;;  %v238_v11 = vrot.slane %v231_v5, %v2077_v15  ;;  %v309_v12 = vcombine.low %v157_v63, %v166_v4  ;;  %v1695_v13 = vcombine.high %v157_v63, %v166_v4  ;;  %v1702_v4 = vld [vmem:[%s2359_s2] ss:$0 sm:$0xff] }
  0xbb   :  { %v274_v16 = vrot.slane %v267_v6, %v2077_v15  ;;  %v333_v24 = vrot.slane %v325_v10, %v2079_v31  ;;  %v401_v30 = vrot.slane %v1696_v14, %v2079_v31  ;;  %v1698_v32 = vcombine.high %v211_v46, %v220_v55  ;;  %1747 = vmatpush3.bf16.msra.mxu0 %v1853_v53 }
  0xbc   :  { %v326_v18 = vcombine.low %v193_v0, %v202_v8  ;;  %v1697_v19 = vcombine.high %v193_v0, %v202_v8  ;;  %v323_v20 = vrot.slane %v309_v12, %v2079_v31  ;;  %v391_v21 = vrot.slane %v1695_v13, %v2079_v31 }
  0xbd   :  { %v343_v22 = vcombine.low %v229_v3, %v238_v11  ;;  %v1699_v23 = vcombine.high %v229_v3, %v238_v11  ;;  %v247_v33 = vrot.slane %v240_v44, %v2077_v15  ;;  %v360_v35 = vcombine.low %v265_v7, %v274_v16 }
  0xbe   :  { %v340_v25 = vrot.slane %v326_v18, %v2079_v31  ;;  %v408_v26 = vrot.slane %v1697_v19, %v2079_v31  ;;  %v324_v28 = vcombine.low %v316_v9, %v323_v20  ;;  %v392_v29 = vcombine.low %v384_v17, %v391_v21 }
  0xbf   :  { %v357_v34 = vrot.slane %v343_v22, %v2079_v31  ;;  %v425_v39 = vrot.slane %v1699_v23, %v2079_v31  ;;  %v1701_v40 = vcombine.high %v265_v7, %v274_v16  ;;  %v350_v41 = vrot.slane %v342_v27, %v2079_v31 }
  0xc0   :  { %v1824_v36 = vpack.i.bf16 %v392_v29, %v324_v28  ;;  %v341_v37 = vcombine.low %v333_v24, %v340_v25  ;;  %v409_v38 = vcombine.low %v401_v30, %v408_v26  ;;  %v418_v42 = vrot.slane %v1698_v32, %v2079_v31 }
  0xc1   :  { %v359_v43 = vcombine.low %v247_v33, %v256_v59  ;;  %v1700_v45 = vcombine.high %v247_v33, %v256_v59  ;;  %v374_v46 = vrot.slane %v360_v35, %v2079_v31  ;;  %v358_v48 = vcombine.low %v350_v41, %v357_v34 }
  0xc2   :  { %1825 = vxpose.xlu1.b32.start [1/4] (short) (narrow) %v1824_v36, 16  ;;  %v1826_v44 = vpack.i.bf16 %v409_v38, %v341_v37  ;;  %v426_v49 = vcombine.low %v418_v42, %v425_v39  ;;  %v442_v50 = vrot.slane %v1701_v40, %v2079_v31  ;;  %v1995_v2 = vmov 0.0  }
  0xc3   :  { %v367_v51 = vrot.slane %v359_v43, %v2079_v31  ;;  %v435_v52 = vrot.slane %v1700_v45, %v2079_v31  ;;  %1752 = vmatprep.subr.bf16.mxu1 %v1995_v2  ;;  %1758 = vmatprep.subr.bf16.mxu0 %v1995_v2 }
  0xc4   :  { %v1828_v54 = vpack.i.bf16 %v426_v49, %v358_v48  ;;  %1754 = vmatprep.mubr.msk.bf16.mxu1 %vm1996_vm1, %v1995_v2 }
  0xc5   :  { %v375_v55 = vcombine.low %v367_v51, %v374_v46  ;;  %v443_v56 = vcombine.low %v435_v52, %v442_v50 }
  0xc6   :  { %1827 = vxpose.xlu1.b32.cont [2/4] (short) (narrow) %v1826_v44, 16 }
  0xc7   :  { %v1830_v57 = vpack.i.bf16 %v443_v56, %v375_v55 }
  0xca   :  { %1829 = vxpose.xlu1.b32.cont [3/4] (short) (narrow) %v1828_v54, 16 }
  0xce   :  { %1831 = vxpose.xlu1.b32.end [4/4] (short) (narrow) %v1830_v57, 16 }
 0x142   :  { %v1832_v58 = vpop.trf.xlu1 }
 0x143   :  { %v1836_v59 = vunpack.i.h.bf16 %v1832_v58  ;;  %v1833_v61 = vunpack.i.l.bf16 %v1832_v58 }
 0x146   :  { %v1837_v60 = vpop.trf.xlu1 }
 0x147   :  { %v1841_v62 = vunpack.i.h.bf16 %v1837_v60  ;;  %v1838_v63 = vunpack.i.l.bf16 %v1837_v60 }
 0x149   :  { %v516_v0 = vpack.c.bf16 %v1838_v63, %v1833_v61  ;;  %v517_v1 = vpack.c.bf16 %v1841_v62, %v1836_v59 }
 0x14b   :  { %1748 = vmatprep.mubr.msk.bf16.mxu0 %vm541_vm0, %v516_v0 }
 0x14c   :  { %1749 = vmatmul.mubr.msk.bf16.vlgmr.msra.gmra.mrb[0].mxu0 %vm541_vm0, %v517_v1 }
 0x14d   :  { %1760 = vmatprep.mubr.msk.bf16.mxu0 %vm1996_vm1, %v1995_v2 }
 0x21f   :  { %v1750_v3 = vpop.f32.mrb[0].mxu0 }
 0x220   :  { %v582_v5 = vpop.f32.mrb[1].mxu0  ;;  %v591_v7 = vadd.f32 %v1750_v3, %v1702_v4 }
 0x221   :  { %v1751_v6 = vpop.f32.mrb[2].mxu0  ;;  %v583_v10 = vadd.f32 %v1702_v4, %v582_v5 }
 0x222   :  { %v594_v8 = vadd.f32 %v1751_v6, %v1702_v4  ;;  %v585_v9 = vpop.f32.mrb[3].mxu0 }
 0x223   :  { %v586_v11 = vadd.f32 %v1702_v4, %v585_v9 }
 0x224   :  { %v2124_v12 = vpack.c.bf16 %v594_v8, %v591_v7 }
 0x225   :  { %v2126_v13 = vpack.c.bf16 %v586_v11, %v583_v10 }
 0x227   :  { %600 = vrot.lane.b32.xlu0 %v2126_v13, %s1989_s8 }
 0x22b   :  { %651 = vrot.lane.b32.xlu0 %v2124_v12, %s1989_s8 }
 0x299   :  { %v601_v14 = vpop.permute.xlu0 %600 }
 0x29a   :  { %v607_v16 = vsel %vm602_vm2, %v601_v14, 0 }
 0x29b   :  { %1753 = vmatpush3.bf16.xpose.msra.mxu1 %v607_v16 }
 0x29c   :  { %1764 = vmatprep.subr.bf16.mxu1 %v1995_v2 }
 0x29d   :  { %v652_v17 = vpop.permute.xlu0 %651 }
 0x29e   :  { %v657_v18 = vsel %vm602_vm2, %v652_v17, 0 }
 0x29f   :  { %1759 = vmatpush3.bf16.xpose.msra.mxu0 %v657_v18 }
 0x2a0   :  { %1770 = vmatprep.subr.bf16.mxu0 %v1995_v2 }
 0x2a2   :  { %1755 = vmatmul.mubr.msk.bf16.vlgmr.msra.gmra.mrb[0].mxu1 %vm602_vm2, %v2126_v13 }
 0x2a3   :  { %1766 = vmatprep.mubr.msk.bf16.mxu1 %vm1996_vm1, %v1995_v2 }
 0x2a6   :  { %1761 = vmatmul.mubr.msk.bf16.vlgmr.msra.gmra.mrb[4].mxu0 %vm602_vm2, %v2124_v12 }
 0x2a7   :  { %1772 = vmatprep.mubr.msk.bf16.mxu0 %vm1996_vm1, %v1995_v2 }
 0x375   :  { %v643_v19 = vpop.f32.mrb[0].mxu1 }
 0x376   :  { %v1756_v20 = vpop.f32.mrb[1].mxu1  ;;  %v700_v28 = vsel %vm602_vm2, %v643_v19, -inf }
 0x377   :  { %v646_v21 = vpop.f32.mrb[2].mxu1 }
 0x378   :  { %v1757_v22 = vpop.f32.mrb[3].mxu1  ;;  %v703_v29 = vsel %vm602_vm2, %v646_v21, -inf }
 0x379   :  { %v693_v23 = vpop.f32.mrb[4].mxu0 }
 0x37a   :  { %v1762_v24 = vpop.f32.mrb[5].mxu0  ;;  %v706_v25 = vsel %vm602_vm2, %v693_v23, -inf }
 0x37b   :  { %707 = vmax.xlane.f32.xlu0 %v706_v25  ;;  %v696_v26 = vpop.f32.mrb[6].mxu0 }
 0x37c   :  { %v1763_v27 = vpop.f32.mrb[7].mxu0  ;;  %v709_v30 = vsel %vm602_vm2, %v696_v26, -inf }
 0x37f   :  { %701 = vmax.xlane.f32.xlu0 %v700_v28 }
 0x383   :  { %704 = vmax.xlane.f32.xlu0 %v703_v29 }
 0x387   :  { %710 = vmax.xlane.f32.xlu0 %v709_v30 }
 0x39d   :  { %746 = vrot.lane.b32.xlu0 %v2126_v13, %s1983_s28 }
 0x3a1   :  { %793 = vrot.lane.b32.xlu0 %v2124_v12, %s1983_s28 }
 0x408   :  { %v708_v32 = vpop.xlane.xlu0 %707 }
 0x409   :  { %v714_v33 = vsub.f32 %v693_v23, %v708_v32 }
 0x40b   :  { %v720_v34 = vmul.f32 1.442695, %v714_v33 }
 0x40c   :  { %v702_v35 = vpop.xlane.xlu0 %701 }
 0x40d   :  { %1856 = vpow2.f32 %v720_v34  ;;  %v712_v36 = vsub.f32 %v643_v19, %v702_v35 }
 0x40f   :  { %v716_v37 = vmul.f32 1.442695, %v712_v36 }
 0x410   :  { %v705_v38 = vpop.xlane.xlu0 %704 }
 0x411   :  { %1858 = vpow2.f32 %v716_v37  ;;  %v713_v39 = vsub.f32 %v646_v21, %v705_v38 }
 0x413   :  { %v718_v43 = vmul.f32 1.442695, %v713_v39 }
 0x414   :  { %v711_v40 = vpop.xlane.xlu0 %710 }
 0x415   :  { %v715_v41 = vsub.f32 %v696_v26, %v711_v40 }
 0x417   :  { %v1857_v42 = vpop.eup %1856  ;;  %v722_v45 = vmul.f32 1.442695, %v715_v41 }
 0x418   :  { %v747_v46 = vpop.permute.xlu0 %746  ;;  %v730_v47 = vsel %vm602_vm2, %v1857_v42, 0.0 }
 0x419   :  { %1860 = vpow2.f32 %v722_v45  ;;  %731 = vadd.xlane.f32.xlu0 %v730_v47  ;;  %1765 = vmatpush3.bf16.msra.mxu1 %v747_v46 }
 0x41a   :  { %1776 = vmatprep.subr.bf16.mxu1 %v1995_v2  ;;  %1862 = vpow2.f32 %v718_v43 }
 0x41b   :  { %v1859_v44 = vpop.eup %1858 }
 0x41c   :  { %v794_v48 = vpop.permute.xlu0 %793  ;;  %v724_v49 = vsel %vm602_vm2, %v1859_v44, 0.0 }
 0x41d   :  { %725 = vadd.xlane.f32.xlu1 %v724_v49  ;;  %1771 = vmatpush3.bf16.msra.mxu0 %v794_v48 }
 0x41e   :  { %1782 = vmatprep.subr.bf16.mxu0 %v1995_v2 }
 0x423   :  { %v1861_v50 = vpop.eup %1860 }
 0x424   :  { %v733_v51 = vsel %vm602_vm2, %v1861_v50, 0.0  ;;  %v1863_v52 = vpop.eup %1862 }
 0x425   :  { %734 = vadd.xlane.f32.xlu0 %v733_v51  ;;  %v727_v53 = vsel %vm602_vm2, %v1863_v52, 0.0 }
 0x429   :  { %728 = vadd.xlane.f32.xlu0 %v727_v53 }
 0x42e   :  { %842 = vrot.lane.b32.xlu1 %v2126_v13, %s1988_s7 }
 0x43f   :  { %893 = vrot.lane.b32.xlu0 %v2124_v12, %s1988_s7 }
 0x443   :  { %840 = vrot.lane.b32.xlu0 %v2126_v13, %s1987_s6 }
 0x447   :  { %891 = vrot.lane.b32.xlu0 %v2124_v12, %s1987_s6 }
 0x4a6   :  { %v732_v54 = vpop.xlane.xlu0 %731 }
 0x4a7   :  { %1864 = vrcp.f32 %v732_v54 }
 0x4aa   :  { %v726_v55 = vpop.xlane.xlu1 %725 }
 0x4ae   :  { %v843_v6 = vpop.permute.xlu1 %842 }
 0x4af   :  { %v848_v9 = vsel %vm602_vm2, %v843_v6, 0  ;;  %v1854_v6 = vld [vmem:[#allocation7] sm:$0xff]  }
 0x4b1   :  { %v1865_v58 = vpop.eup %1864 }
 0x4b2   :  { %v735_v56 = vpop.xlane.xlu0 %734  ;;  %v741_v61 = vmul.f32 %v1865_v58, %v1857_v42 }
 0x4b3   :  { %1866 = vrcp.f32 %v735_v56 }
 0x4b4   :  { %1868 = vrcp.f32 %v726_v55 }
 0x4b6   :  { %v729_v57 = vpop.xlane.xlu0 %728 }
 0x4b7   :  { %1870 = vrcp.f32 %v729_v57 }
 0x4ba   :  { %v894_v60 = vpop.permute.xlu0 %893 }
 0x4bb   :  { %v899_v5 = vsel %vm602_vm2, %v894_v60, 0 }
 0x4bd   :  { %v1867_v59 = vpop.eup %1866 }
 0x4be   :  { %v743_v62 = vmul.f32 %v1867_v59, %v1861_v50  ;;  %v1869_v63 = vpop.eup %1868  ;;  %v841_v7 = vpop.permute.xlu0 %840 }
 0x4bf   :  { %v737_v3 = vmul.f32 %v1869_v63, %v1859_v44 }
 0x4c0   :  { %v745_v0 = vpack.c.bf16 %v743_v62, %v741_v61 }
 0x4c1   :  { %v1871_v1 = vpop.eup %1870 }
 0x4c2   :  { %v739_v4 = vmul.f32 %v1871_v1, %v1863_v52  ;;  %1773 = vmatmul.mubr.msk.bf16.vlgmr.msra.gmra.mrb[8].mxu0 %vm602_vm2, %v745_v0  ;;  %v892_v10 = vpop.permute.xlu0 %891 }
 0x4c3   :  { %1783 = vmatpush3.bf16.xpose.msra.mxu0 %v899_v5  ;;  %1784 = vmatprep.mubr.msk.bf16.mxu0 %vm1996_vm1, %v1995_v2 }
 0x4c4   :  { %v744_v8 = vpack.c.bf16 %v739_v4, %v737_v3  ;;  %1794 = vmatprep.subr.bf16.mxu0 %v1995_v2 }
 0x4c6   :  { %1767 = vmatmul.mubr.msk.bf16.vlgmr.msra.gmra.mrb[4].mxu1 %vm602_vm2, %v744_v8 }
 0x4c7   :  { %1777 = vmatpush3.bf16.xpose.msra.mxu1 %v848_v9  ;;  %1778 = vmatprep.mubr.msk.bf16.mxu1 %vm1996_vm1, %v1995_v2 }
 0x4c8   :  { %1788 = vmatprep.subr.bf16.mxu1 %v1995_v2 }
 0x4ca   :  { %1785 = vmatmul.mubr.msk.bf16.vlgmr.msra.gmra.mrb[12].mxu0 %vm602_vm2, %v892_v10 }
 0x4cb   :  { %1796 = vmatprep.mubr.msk.bf16.mxu0 %vm1996_vm1, %v1995_v2 }
 0x4ce   :  { %1779 = vmatmul.mubr.msk.bf16.vlgmr.msra.gmra.mrb[8].mxu1 %vm602_vm2, %v841_v7  ;;  %v1855_v7 = vld [vmem:[#allocation7 + $0x8] sm:$0xff]  }
 0x4cf   :  { %1790 = vmatprep.mubr.msk.bf16.mxu1 %vm1996_vm1, %v1995_v2 }
 0x595   :  { %v2182_v11 = vpop.f32.mrb[8].mxu0 }
 0x596   :  { %v1774_v14 = vpop.f32.mrb[9].mxu0 }
 0x597   :  { %v2184_v16 = vpop.f32.mrb[10].mxu0 }
 0x598   :  { %v1775_v17 = vpop.f32.mrb[11].mxu0 }
 0x599   :  { %v2186_v18 = vpop.f32.mrb[4].mxu1 }
 0x59a   :  { %v1768_v19 = vpop.f32.mrb[5].mxu1 }
 0x59b   :  { %v2188_v20 = vpop.f32.mrb[6].mxu1 }
 0x59c   :  { %v1769_v21 = vpop.f32.mrb[7].mxu1 }
 0x59d   :  { %v935_v22 = vpop.f32.mrb[12].mxu0 }
 0x59e   :  { %v1786_v23 = vpop.f32.mrb[13].mxu0  ;;  %v948_v33 = vsel %vm602_vm2, %v935_v22, -inf }
 0x59f   :  { %v938_v24 = vpop.f32.mrb[14].mxu0 }
 0x5a0   :  { %v1787_v25 = vpop.f32.mrb[15].mxu0  ;;  %v951_v34 = vsel %vm602_vm2, %v938_v24, -inf }
 0x5a1   :  { %v884_v26 = vpop.f32.mrb[8].mxu1 }
 0x5a2   :  { %v1780_v27 = vpop.f32.mrb[9].mxu1  ;;  %v942_v28 = vsel %vm602_vm2, %v884_v26, -inf }
 0x5a3   :  { %943 = vmax.xlane.f32.xlu0 %v942_v28  ;;  %v887_v29 = vpop.f32.mrb[10].mxu1 }
 0x5a4   :  { %v1781_v30 = vpop.f32.mrb[11].mxu1  ;;  %v945_v32 = vsel %vm602_vm2, %v887_v29, -inf }
 0x5a5   :  { %946 = vmax.xlane.f32.xlu1 %v945_v32 }
 0x5a7   :  { %949 = vmax.xlane.f32.xlu0 %v948_v33 }
 0x5ab   :  { %952 = vmax.xlane.f32.xlu0 %v951_v34 }
 0x630   :  { %v944_v35 = vpop.xlane.xlu0 %943 }
 0x631   :  { %v954_v36 = vsub.f32 %v884_v26, %v944_v35 }
 0x632   :  { %v947_v37 = vpop.xlane.xlu1 %946 }
 0x633   :  { %v958_v40 = vmul.f32 1.442695, %v954_v36  ;;  %v955_v41 = vsub.f32 %v887_v29, %v947_v37 }
 0x634   :  { %v950_v38 = vpop.xlane.xlu0 %949 }
 0x635   :  { %v956_v39 = vsub.f32 %v935_v22, %v950_v38  ;;  %v960_v46 = vmul.f32 1.442695, %v955_v41 }
 0x637   :  { %v962_v42 = vmul.f32 1.442695, %v956_v39 }
 0x638   :  { %v953_v43 = vpop.xlane.xlu0 %952 }
 0x639   :  { %1872 = vpow2.f32 %v962_v42  ;;  %v957_v45 = vsub.f32 %v938_v24, %v953_v43 }
 0x63a   :  { %1874 = vpow2.f32 %v958_v40 }
 0x63b   :  { %v964_v47 = vmul.f32 1.442695, %v957_v45 }
 0x63d   :  { %1876 = vpow2.f32 %v964_v47 }
 0x63e   :  { %1878 = vpow2.f32 %v960_v46 }
 0x643   :  { %v1873_v44 = vpop.eup %1872 }
 0x644   :  { %v972_v48 = vsel %vm602_vm2, %v1873_v44, 0.0  ;;  %v1875_v49 = vpop.eup %1874 }
 0x645   :  { %973 = vadd.xlane.f32.xlu0 %v972_v48  ;;  %v966_v51 = vsel %vm602_vm2, %v1875_v49, 0.0 }
 0x647   :  { %v1877_v50 = vpop.eup %1876 }
 0x648   :  { %v975_v52 = vsel %vm602_vm2, %v1877_v50, 0.0  ;;  %v1879_v53 = vpop.eup %1878 }
 0x649   :  { %967 = vadd.xlane.f32.xlu0 %v966_v51  ;;  %976 = vadd.xlane.f32.xlu1 %v975_v52  ;;  %v969_v54 = vsel %vm602_vm2, %v1879_v53, 0.0 }
 0x64d   :  { %970 = vadd.xlane.f32.xlu1 %v969_v54 }
 0x65e   :  { %1035 = vrot.lane.b32.xlu1 %v2124_v12, %s1990_s9 }
 0x65f   :  { %988 = vrot.lane.b32.xlu0 %v2126_v13, %s1990_s9 }
 0x6d2   :  { %v974_v55 = vpop.xlane.xlu0 %973 }
 0x6d3   :  { %1880 = vrcp.f32 %v974_v55 }
 0x6d6   :  { %v977_v56 = vpop.xlane.xlu1 %976  ;;  %v968_v57 = vpop.xlane.xlu0 %967 }
 0x6d7   :  { %1882 = vrcp.f32 %v977_v56 }
 0x6d8   :  { %1884 = vrcp.f32 %v968_v57 }
 0x6da   :  { %v971_v58 = vpop.xlane.xlu1 %970  ;;  %v989_v59 = vpop.permute.xlu0 %988 }
 0x6db   :  { %1886 = vrcp.f32 %v971_v58  ;;  %1789 = vmatpush3.bf16.msra.mxu1 %v989_v59 }
 0x6dc   :  { %1800 = vmatprep.subr.bf16.mxu1 %v1854_v6 }
 0x6dd   :  { %v1881_v61 = vpop.eup %1880 }
 0x6de   :  { %v1036_v60 = vpop.permute.xlu1 %1035  ;;  %v983_v63 = vmul.f32 %v1881_v61, %v1873_v44 }
 0x6df   :  { %1795 = vmatpush3.bf16.msra.mxu0 %v1036_v60 }
 0x6e1   :  { %v1883_v62 = vpop.eup %1882 }
 0x6e2   :  { %v985_v0 = vmul.f32 %v1883_v62, %v1877_v50  ;;  %v1885_v12 = vpop.eup %1884 }
 0x6e3   :  { %v979_v13 = vmul.f32 %v1885_v12, %v1875_v49 }
 0x6e4   :  { %v987_v1 = vpack.c.bf16 %v985_v0, %v983_v63 }
 0x6e5   :  { %v1887_v3 = vpop.eup %1886 }
 0x6e6   :  { %v981_v4 = vmul.f32 %v1887_v3, %v1879_v53  ;;  %1797 = vmatmul.mubr.msk.bf16.vlgmr.msra.gmra.mrb[16].mxu0 %vm602_vm2, %v987_v1 }
 0x6e8   :  { %v986_v5 = vpack.c.bf16 %v981_v4, %v979_v13 }
 0x6ea   :  { %1791 = vmatmul.mubr.msk.bf16.vlgmr.msra.gmra.mrb[12].mxu1 %vm602_vm2, %v986_v5 }
 0x6eb   :  { %1801 = vmatpush3.bf16.msra.mxu1 %v1854_v6 }
 0x6ec   :  { %1802 = vmatprep.subr.bf16.mxu1 %v1855_v7 }
 0x6ef   :  { %1803 = vmatpush3.bf16.msra.mxu1 %v1855_v7 }
 0x7b9   :  { %v1075_v8 = vpop.f32.mrb[16].mxu0 }
 0x7ba   :  { %v1798_v9 = vpop.f32.mrb[17].mxu0 }
 0x7bb   :  { %v1078_v10 = vpop.f32.mrb[18].mxu0 }
 0x7bc   :  { %v1847_v14 = vpack.i.bf16 %v1078_v10, %v1075_v8  ;;  %v1799_v17 = vpop.f32.mrb[19].mxu0 }
 0x7bd   :  { %v1028_v19 = vpop.f32.mrb[12].mxu1 }
 0x7be   :  { %v1792_v21 = vpop.f32.mrb[13].mxu1  ;;  %1848 = vrot.lane.b32.xlu0 %v1847_v14, %s1992_s29 }
 0x7bf   :  { %v1031_v22 = vpop.f32.mrb[14].mxu1 }
 0x7c0   :  { %v1842_v23 = vpack.i.bf16 %v1031_v22, %v1028_v19  ;;  %v1793_v24 = vpop.f32.mrb[15].mxu1 }
 0x7c2   :  { %1843 = vrot.lane.b32.xlu1 %v1842_v23, %s1992_s29 }
 0x830   :  { %v1849_v25 = vpop.permute.xlu0 %1848 }
 0x831   :  { %v1851_v26 = vunpack.i.h.bf16 %v1849_v25  ;;  %v1850_v27 = vunpack.i.l.bf16 %v1849_v25 }
 0x833   :  { %v1101_v28 = vsel %vm602_vm2, %v2184_v16, %v1851_v26  ;;  %v1100_v29 = vsel %vm602_vm2, %v2182_v11, %v1850_v27  ;;  %v1715_v16 = vld [vmem:[%s2361_s4] ss:$0 sm:$0xff]  ;;  %s1997_s4 = smov [#allocation8]  }
 0x834   :  { %v1103_v30 = vpack.c.bf16 %v1101_v28, %v1100_v29  ;;  %v1844_v32 = vpop.permute.xlu1 %1843 }
 0x835   :  { %v1846_v33 = vunpack.i.h.bf16 %v1844_v32  ;;  %v1845_v34 = vunpack.i.l.bf16 %v1844_v32 }
 0x837   :  { %v1099_v35 = vsel %vm602_vm2, %v2188_v20, %v1846_v33  ;;  %v1098_v36 = vsel %vm602_vm2, %v2186_v18, %v1845_v34 }
 0x838   :  { %v1102_v37 = vpack.c.bf16 %v1099_v35, %v1098_v36 }
 0x83a   :  { %1804 = vmatprep.mubr.msk.bf16.mxu1 %vm541_vm0, %v1102_v37 }
 0x83b   :  { %1805 = vmatmul.mubr.msk.bf16.vlgmr.msra.gmra.mrb[16].mxu1 %vm541_vm0, %v1103_v30 }
 0x90e   :  { %v1806_v11 = vpop.f32.mrb[16].mxu1 }
 0x90f   :  { %v1176_v38 = vadd.f32 %v1806_v11, %v1715_v16  ;;  %v1167_v39 = vpop.f32.mrb[17].mxu1 }
 0x910   :  { %v1168_v40 = vadd.f32 %v1715_v16, %v1167_v39  ;;  %v1807_v41 = vpop.f32.mrb[18].mxu1 }
 0x911   :  { %1214 = vxpose.xlu0.b32.start [1/2] (short) (narrow) %v1176_v38, 32  ;;  %v1170_v42 = vpop.f32.mrb[19].mxu1  ;;  %v1179_v20 = vadd.f32 %v1807_v41, %v1715_v16 }
 0x912   :  { %1182 = vxpose.xlu1.b32.start [1/2] (short) (narrow) %v1168_v40, 32  ;;  %v1171_v43 = vadd.f32 %v1715_v16, %v1170_v42 }
 0x915   :  { %1215 = vxpose.xlu0.b32.end [2/2] (short) (narrow) %v1179_v20, 32 }
 0x916   :  { %1183 = vxpose.xlu1.b32.end [2/2] (short) (narrow) %v1171_v43, 32 }
 0x991   :  { %v1230_v18 = vpop.trf.xlu0 }
 0x992   :  { %v1268_v45 = vrot.slane %v1230_v18, %v2079_v31  ;;  %v1198_v46 = vpop.trf.xlu1  ;;  %v1261_v44 = vcombine.high %v1230_v18, %v1995_v2 }
 0x993   :  { %v1253_v47 = vrot.slane %v1198_v46, %v2079_v31  ;;  %v1246_v48 = vcombine.high %v1198_v46, %v1995_v2 }
 0x994   :  { %v1275_v56 = vrot.slane %v1261_v44, %v2079_v31 }
 0x995   :  { %v1276_v49 = vcombine.low %v1253_v47, %v1268_v45  ;;  %v1277_v50 = vcombine.high %v1253_v47, %v1268_v45  ;;  %v1231_v51 = vpop.trf.xlu0  ;;  %v1260_v57 = vrot.slane %v1246_v48, %v2079_v31 }
 0x996   :  { %v1334_v52 = vrot.slane %v1231_v51, %v2079_v31  ;;  %v1199_v53 = vpop.trf.xlu1  ;;  %v1327_v59 = vcombine.high %v1231_v51, %v1995_v2 }
 0x997   :  { %v2225_v54 = vrot.slane %v1276_v49, %v2077_v15  ;;  %v1319_v55 = vrot.slane %v1199_v53, %v2079_v31  ;;  %v1291_v58 = vrot.slane %v1277_v50, %v2077_v15  ;;  %v1312_v60 = vcombine.high %v1199_v53, %v1995_v2 }
 0x998   :  { %v1292_v12 = vcombine.low %v1260_v57, %v1275_v56  ;;  %v1341_v1 = vrot.slane %v1327_v59, %v2079_v31  ;;  %v1293_v13 = vcombine.high %v1260_v57, %v1275_v56 }
 0x999   :  { %v1343_v61 = vcombine.high %v1319_v55, %v1334_v52  ;;  %v1308_v62 = vcombine.high %v2225_v54, %v1995_v2  ;;  %1515 = vrot.lane.b32.xlu1 %v1291_v58, %s1991_s3  ;;  %v1309_v0 = vcombine.high %v1291_v58, %v1995_v2  ;;  %v1326_v3 = vrot.slane %v1312_v60, %v2079_v31  ;;  %v1232_v7 = vpop.trf.xlu0 }
 0x99a   :  { %v1300_v4 = vrot.slane %v1292_v12, %v2077_v15  ;;  %v1200_v8 = vpop.trf.xlu1  ;;  %v1307_v9 = vrot.slane %v1293_v13, %v2077_v15  ;;  %v1342_v17 = vcombine.low %v1319_v55, %v1334_v52  ;;  %v1400_v27 = vrot.slane %v1232_v7, %v2079_v31 }
 0x99b   :  { %1511 = vrot.lane.b32.xlu0 %v1308_v62, %s1992_s29  ;;  %v1357_v63 = vrot.slane %v1343_v61, %v2077_v15  ;;  %v1358_v6 = vcombine.low %v1326_v3, %v1341_v1  ;;  %v1359_v10 = vcombine.high %v1326_v3, %v1341_v1  ;;  %v1385_v28 = vrot.slane %v1200_v8, %v2079_v31 }
 0x99c   :  { %v1310_v19 = vcombine.high %v1300_v4, %v1995_v2  ;;  %v2258_v26 = vrot.slane %v1342_v17, %v2077_v15  ;;  %v1311_v29 = vcombine.high %v1307_v9, %v1995_v2  ;;  %v1393_v11 = vcombine.high %v1232_v7, %v1995_v2 }
 0x99d   :  { %1519 = vrot.lane.b32.xlu1 %v1309_v0, %s1990_s9  ;;  %v1375_v5 = vcombine.high %v1357_v63, %v1995_v2  ;;  %v1366_v14 = vrot.slane %v1358_v6, %v2077_v15  ;;  %v1233_v21 = vpop.trf.xlu0  ;;  %v1373_v23 = vrot.slane %v1359_v10, %v2077_v15  ;;  %v1408_v33 = vcombine.low %v1385_v28, %v1400_v27 }
 0x99e   :  { %v1201_v22 = vpop.trf.xlu1  ;;  %v1466_v24 = vrot.slane %v1233_v21, %v2079_v31  ;;  %v1409_v34 = vcombine.high %v1385_v28, %v1400_v27  ;;  %v1374_v35 = vcombine.high %v2258_v26, %v1995_v2  ;;  %v1378_v38 = vcombine.high %v1200_v8, %v1995_v2 }
 0x99f   :  { %1543 = vrot.lane.b32.xlu0 %v1357_v63, %s1991_s3  ;;  %v1451_v25 = vrot.slane %v1201_v22, %v2079_v31  ;;  %v1376_v30 = vcombine.high %v1366_v14, %v1995_v2  ;;  %v1377_v37 = vcombine.high %v1373_v23, %v1995_v2  ;;  %v2275_v39 = vrot.slane %v1408_v33, %v2077_v15 }
 0x9a0   :  { %v1423_v40 = vrot.slane %v1409_v34, %v2077_v15  ;;  %v1459_v41 = vcombine.high %v1233_v21, %v1995_v2  ;;  %v1444_v42 = vcombine.high %v1201_v22, %v1995_v2  ;;  %v1407_v43 = vrot.slane %v1393_v11, %v2079_v31 }
 0x9a1   :  { %1523 = vrot.lane.b32.xlu1 %v1300_v4, %s1983_s28  ;;  %v1475_v32 = vcombine.high %v1451_v25, %v1466_v24  ;;  %v1474_v36 = vcombine.low %v1451_v25, %v1466_v24  ;;  %v1392_v18 = vrot.slane %v1378_v38, %v2079_v31  ;;  %v1440_v45 = vcombine.high %v2275_v39, %v1995_v2 }
 0x9a2   :  { %v1473_v46 = vrot.slane %v1459_v41, %v2079_v31  ;;  %v1458_v47 = vrot.slane %v1444_v42, %v2079_v31  ;;  %v1441_v48 = vcombine.high %v1423_v40, %v1995_v2 }
 0x9a3   :  { %1547 = vrot.lane.b32.xlu0 %v1375_v5, %s1990_s9  ;;  %v1489_v16 = vrot.slane %v1475_v32, %v2077_v15  ;;  %v2281_v20 = vrot.slane %v1474_v36, %v2077_v15  ;;  %v1424_v49 = vcombine.low %v1392_v18, %v1407_v43  ;;  %v1425_v52 = vcombine.high %v1392_v18, %v1407_v43 }
 0x9a4   :  { %v1490_v51 = vcombine.low %v1458_v47, %v1473_v46  ;;  %v1491_v55 = vcombine.high %v1458_v47, %v1473_v46 }
 0x9a5   :  { %1531 = vrot.lane.b32.xlu1 %v1307_v9, %s1989_s8  ;;  %v1506_v44 = vcombine.high %v2281_v20, %v1995_v2  ;;  %v1507_v50 = vcombine.high %v1489_v16, %v1995_v2  ;;  %v1432_v53 = vrot.slane %v1424_v49, %v2077_v15  ;;  %v1439_v57 = vrot.slane %v1425_v52, %v2077_v15 }
 0x9a6   :  { %v1498_v56 = vrot.slane %v1490_v51, %v2077_v15  ;;  %v1505_v58 = vrot.slane %v1491_v55, %v2077_v15 }
 0x9a7   :  { %1551 = vrot.lane.b32.xlu0 %v1366_v14, %s1983_s28  ;;  %v1442_v59 = vcombine.high %v1432_v53, %v1995_v2  ;;  %v1443_v61 = vcombine.high %v1439_v57, %v1995_v2 }
 0x9a8   :  { %v1508_v60 = vcombine.high %v1498_v56, %v1995_v2  ;;  %v1509_v62 = vcombine.high %v1505_v58, %v1995_v2 }
 0x9a9   :  { %1527 = vrot.lane.b32.xlu1 %v1310_v19, %s1988_s7 }
 0x9ab   :  { %1559 = vrot.lane.b32.xlu0 %v1373_v23, %s1989_s8 }
 0x9ad   :  { %1535 = vrot.lane.b32.xlu1 %v1311_v29, %s1987_s6 }
 0x9af   :  { %1555 = vrot.lane.b32.xlu0 %v1376_v30, %s1988_s7 }
 0x9b1   :  { %1539 = vrot.lane.b32.xlu1 %v1374_v35, %s1992_s29 }
 0x9b3   :  { %1563 = vrot.lane.b32.xlu0 %v1377_v37, %s1987_s6 }
 0x9b5   :  { %1571 = vrot.lane.b32.xlu1 %v1423_v40, %s1991_s3 }
 0x9b7   :  { %1599 = vrot.lane.b32.xlu0 %v1489_v16, %s1991_s3 }
 0x9b9   :  { %1567 = vrot.lane.b32.xlu1 %v1440_v45, %s1992_s29 }
 0x9bb   :  { %1595 = vrot.lane.b32.xlu0 %v1506_v44, %s1992_s29 }
 0x9bd   :  { %1575 = vrot.lane.b32.xlu1 %v1441_v48, %s1990_s9 }
 0x9bf   :  { %1603 = vrot.lane.b32.xlu0 %v1507_v50, %s1990_s9 }
 0x9c1   :  { %1579 = vrot.lane.b32.xlu1 %v1432_v53, %s1983_s28 }
 0x9c3   :  { %1607 = vrot.lane.b32.xlu0 %v1498_v56, %s1983_s28  ;;  %s1684_s28 = sshll.u32 %s1997_s4, 4  ;;  %s1685_s28 = int_to_ptr.vmem [resolvable:$true] %s1684_s28 }
 0x9c4   :  { %s1954_s13 = scalar_lea.vmem %s1685_s28, 128  ;;  %p1959_p11 = scmp.lt.s32.totalorder %s1685_s28, %s1685_s28 }
 0x9c5   :  { %1587 = vrot.lane.b32.xlu1 %v1439_v57, %s1989_s8  ;;  %p1955_p10 = scmp.ne.s32.totalorder %s1685_s28, %s1954_s13  ;;  %p1960_p12 = scmp.lt.s32.totalorder %s1954_s13, %s1954_s13 }
 0x9c7   :  { %1615 = vrot.lane.b32.xlu0 %v1505_v58, %s1989_s8  ;;  %p1961_p13 = por %p1960_p12, %p1959_p11 }
 0x9c9   :  { %1583 = vrot.lane.b32.xlu1 %v1442_v59, %s1988_s7  ;;  %p1962_p0 = pnand %p1961_p13, %p1955_p10 }
 0x9cb   :  { %1611 = vrot.lane.b32.xlu0 %v1508_v60, %s1988_s7 }
 0x9cd   :  { %1591 = vrot.lane.b32.xlu1 %v1443_v61, %s1987_s6 }
 0x9cf   :  { %1619 = vrot.lane.b32.xlu0 %v1509_v62, %s1987_s6 }
 0xa0b   :  { %v1516_v15 = vpop.permute.xlu1 %1515 }
 0xa0d   :  { %v1512_v63 = vpop.permute.xlu0 %1511 }
 0xa0e   :  { %v1622_v27 = vsel %vm602_vm2, %v2225_v54, %v1512_v63 }
 0xa0f   :  { %v1520_v0 = vpop.permute.xlu1 %1519  ;;  %v1623_v32 = vsel %vm541_vm0, %v1622_v27, %v1516_v15 }
 0xa10   :  { %v1625_v54 = vsel %vm1624_vm3, %v1623_v32, %v1520_v0 }
 0xa11   :  { %v1544_v12 = vpop.permute.xlu0 %1543 }
 0xa13   :  { %v1524_v1 = vpop.permute.xlu1 %1523 }
 0xa14   :  { %v1627_v37 = vsel %vm1626_vm4, %v1625_v54, %v1524_v1 }
 0xa15   :  { %v1548_v3 = vpop.permute.xlu0 %1547 }
 0xa17   :  { %v1532_v13 = vpop.permute.xlu1 %1531 }
 0xa19   :  { %v1552_v4 = vpop.permute.xlu0 %1551 }
 0xa1b   :  { %v1528_v5 = vpop.permute.xlu1 %1527 }
 0xa1c   :  { %v1629_v40 = vsel %vm1628_vm5, %v1627_v37, %v1528_v5 }
 0xa1d   :  { %v1560_v6 = vpop.permute.xlu0 %1559  ;;  %v1631_v44 = vsel %vm1630_vm6, %v1629_v40, %v1532_v13 }
 0xa1f   :  { %v1536_v7 = vpop.permute.xlu1 %1535 }
 0xa20   :  { %v1633_v48 = vsel %vm1632_vm7, %v1631_v44, %v1536_v7 }
 0xa21   :  { %v1556_v8 = vpop.permute.xlu0 %1555 }
 0xa23   :  { %v1540_v9 = vpop.permute.xlu1 %1539 }
 0xa24   :  { %v1634_v17 = vsel %vm602_vm2, %v2258_v26, %v1540_v9 }
 0xa25   :  { %v1564_v10 = vpop.permute.xlu0 %1563  ;;  %v1635_v22 = vsel %vm541_vm0, %v1634_v17, %v1544_v12 }
 0xa26   :  { %v1636_v25 = vsel %vm1624_vm3, %v1635_v22, %v1548_v3 }
 0xa27   :  { %v1572_v14 = vpop.permute.xlu1 %1571  ;;  %v1637_v29 = vsel %vm1626_vm4, %v1636_v25, %v1552_v4 }
 0xa28   :  { %v1638_v26 = vsel %vm1628_vm5, %v1637_v29, %v1556_v8 }
 0xa29   :  { %v1600_v2 = vpop.permute.xlu0 %1599  ;;  %v1639_v16 = vsel %vm1630_vm6, %v1638_v26, %v1560_v6 }
 0xa2a   :  { %v1640_v45 = vsel %vm1632_vm7, %v1639_v16, %v1564_v10 }
 0xa2b   :  { %v1568_v19 = vpop.permute.xlu1 %1567  ;;  %v1659_v50 = vcombine.low %v1633_v48, %v1640_v45 }
 0xa2c   :  { %v1641_v33 = vsel %vm602_vm2, %v2275_v39, %v1568_v19 }
 0xa2d   :  { %v1596_v21 = vpop.permute.xlu0 %1595  ;;  %v1642_v11 = vsel %vm541_vm0, %v1641_v33, %v1572_v14  ;;  %v1667_v58 = vrot.slane %v1659_v50, %v2079_v31 }
 0xa2e   :  { %v1648_v34 = vsel %vm602_vm2, %v2281_v20, %v1596_v21 }
 0xa2f   :  { %v1576_v23 = vpop.permute.xlu1 %1575  ;;  %v1649_v38 = vsel %vm541_vm0, %v1648_v34, %v1600_v2 }
 0xa30   :  { %v1643_v39 = vsel %vm1624_vm3, %v1642_v11, %v1576_v23 }
 0xa31   :  { %v1604_v24 = vpop.permute.xlu0 %1603 }
 0xa32   :  { %v1650_v41 = vsel %vm1624_vm3, %v1649_v38, %v1604_v24 }
 0xa33   :  { %v1580_v28 = vpop.permute.xlu1 %1579 }
 0xa34   :  { %v1644_v20 = vsel %vm1626_vm4, %v1643_v39, %v1580_v28 }
 0xa35   :  { %v1608_v30 = vpop.permute.xlu0 %1607 }
 0xa36   :  { %v1651_v43 = vsel %vm1626_vm4, %v1650_v41, %v1608_v30 }
 0xa37   :  { %v1588_v35 = vpop.permute.xlu1 %1587 }
 0xa39   :  { %v1616_v36 = vpop.permute.xlu0 %1615 }
 0xa3b   :  { %v1584_v42 = vpop.permute.xlu1 %1583 }
 0xa3c   :  { %v1645_v46 = vsel %vm1628_vm5, %v1644_v20, %v1584_v42 }
 0xa3d   :  { %v1612_v18 = vpop.permute.xlu0 %1611  ;;  %v1646_v51 = vsel %vm1630_vm6, %v1645_v46, %v1588_v35 }
 0xa3e   :  { %v1652_v47 = vsel %vm1628_vm5, %v1651_v43, %v1612_v18 }
 0xa3f   :  { %v1592_v49 = vpop.permute.xlu1 %1591  ;;  %v1653_v52 = vsel %vm1630_vm6, %v1652_v47, %v1616_v36 }
 0xa40   :  { %v1647_v55 = vsel %vm1632_vm7, %v1646_v51, %v1592_v49 }
 0xa41   :  { %v1620_v53 = vpop.permute.xlu0 %1619 }
 0xa42   :  { %v1654_v56 = vsel %vm1632_vm7, %v1653_v52, %v1620_v53 }
 0xa43   :  { %v1660_v57 = vcombine.low %v1647_v55, %v1654_v56 }
 0xa45   :  { %v1674_v59 = vrot.slane %v1660_v57, %v2079_v31 }
 0xa47   :  { %v1675_v60 = vcombine.low %v1667_v58, %v1674_v59 }
 0xa49   :  { %1677 = vst [vmem:[#allocation8] sm:$0xff] %v1675_v60 }
 0xa4a   :  { %1965 = shalt.err (!%p1962_p0)
}
 0xa4b   :  { %s1966_s16 = scalar_lea.hbm %s2362_s5, 128 }
 0xa4c   :  { %p1967_p1 = scmp.ne.s32.totalorder %s2362_s5, %s1966_s16  ;;  %p1970_p2 = scmp.lt.u32.totalorder %s1966_s16, %s2362_s5 }
 0xa4e   :  { %p1972_p3 = pnand %p1970_p2, %p1967_p1 }
 0xa50   :  { %1975 = shalt.err (!%p1972_p3)
}
 0xa51   :  { %1687 = dma.vmem_to_hbm [thread:$0]  %s1685_s28, 128, %s2362_s5, [#allocation4]  }
 0xa52   :  { %1980 = dma.done.wait [#allocation4], 128  }
 0xa53   :  { %1981 = vsyncadd [#allocation4], 4294967168 }
 0xa54   :  { %1691 = vsyncpa [#allocation3], 1 }
 0xa55   :  { %1692 = vsyncpa [#allocation6], 1 }
 0xa56   :  { %1693 = vsyncpa [#allocation4], 1 }

</bundles_post_ra>
